<compile_context>
chip_gen: v7x
topology: tpu7x:2x2x1
jax: 0.10.0
libtpu: 0.0.40
codegen_flags: <defaults>
</compile_context>

<pallas_src>
import functools

import jax
import jax.numpy as jnp
from jax.experimental import pallas as pl
from jax.experimental.pallas import tpu as pltpu


def _conv_block_kernel(p_ref, w_ref, scale_ref, shift_ref, o_ref, *,
                       THp, PP, Wpool, Kdim, Cp, relu):
    """Fused im2col-matmul + affine + max-pool + ReLU for one (batch, row-tile).

    p_ref:     (1, THp*PP*Wpool, Kdim) bf16  im2col rows, ordered (hp, pool_win, wp)
    w_ref:     (Kdim, Cp)              bf16  weights, Cout zero-padded to Cp
    scale_ref: (1, Cp)                 f32   per-channel scale (BN fold or 1)
    shift_ref: (1, Cp)                 f32   per-channel shift (bias / BN fold)
    o_ref:     (1, THp, Wpool, Cp)     f32   pooled, activated output tile
    """
    lhs = p_ref[0]                                            # (M, Kdim), already 2-D
    acc = jnp.dot(lhs, w_ref[...],
                  preferred_element_type=jnp.float32)         # single MXU matmul, f32 acc
    y = acc * scale_ref[0] + shift_ref[0]                     # affine BEFORE pool
    y = y.reshape(THp, PP, Wpool, Cp)                         # minor dims untouched -> cheap
    if PP > 1:
        y = jnp.max(y, axis=1)                                # max-pool = leading-axis max (VPU)
    else:
        y = y.reshape(THp, Wpool, Cp)
    if relu:
        y = jnp.maximum(y, 0.0)
    o_ref[0] = y.astype(o_ref.dtype)                          # lane-dense (Cp=128k) store


def conv_block(x_nchw, weight_oihw, bias, *, stride=1, padding=None,
               batch_norm=False, bn_params=None, max_pool=None,
               activation=True, eps=1e-5):
    """Pallas implementation of ConvBlock.forward (NCHW in / NCHW out)."""
    assert stride == 1  # TODO(synk): strided convolution not implemented in-kernel
    N, Cin, H, W = x_nchw.shape
    Cout, Cin_w, KH, KW = weight_oihw.shape
    assert Cin == Cin_w
    pad = padding if padding is not None else KH // 2

    Ho = H + 2 * pad - KH + 1
    Wo = W + 2 * pad - KW + 1
    if max_pool:
        if isinstance(max_pool, (tuple, list)):
            ph, pw = int(max_pool[0]), int(max_pool[1])
        else:
            ph = pw = int(max_pool)
    else:
        ph = pw = 1
    assert Ho % ph == 0 and Wo % pw == 0
    Hpool, Wpool, PP = Ho // ph, Wo // pw, ph * pw
    Kdim = KH * KW * Cin
    Cp = ((Cout + 127) // 128) * 128          # lane-dense padded channel count

    # ---- Wrapper-side layout plumbing (fused by XLA into one pass over a tiny tensor).
    x_nhwc = jnp.transpose(x_nchw, (0, 2, 3, 1))
    x_pad = jnp.pad(x_nhwc, ((0, 0), (pad, pad), (pad, pad), (0, 0)))
    cols = jnp.concatenate(
        [x_pad[:, kh:kh + Ho, kw:kw + Wo, :]
         for kh in range(KH) for kw in range(KW)], axis=-1)       # (N, Ho, Wo, Kdim)
    # Reorder rows so the pool window is a leading axis of the matmul M dimension:
    # M row order = (hp, dh, dw, wp).
    cols = cols.reshape(N, Hpool, ph, Wpool, pw, Kdim)
    cols = jnp.transpose(cols, (0, 1, 2, 4, 3, 5))                # (N, Hpool, ph, pw, Wpool, K)

    # Row-tile over pooled output rows; keep f32 accumulator <= (128, Cp).
    rows_per_hp = PP * Wpool
    THp = 1
    for t in range(1, Hpool + 1):
        if Hpool % t == 0 and t * rows_per_hp <= 128:
            THp = t
    RT = Hpool // THp
    M = THp * rows_per_hp

    patches = cols.reshape(N * RT, M, Kdim).astype(jnp.bfloat16)  # bf16 MXU fast path

    # OIHW -> (KH*KW*Cin, Cout) matching the patch K order, pad Cout -> Cp, bf16.
    w2 = jnp.transpose(weight_oihw, (2, 3, 1, 0)).reshape(Kdim, Cout)
    w2 = jnp.pad(w2, ((0, 0), (0, Cp - Cout))).astype(jnp.bfloat16)

    # Fold conv bias and (eval-mode) BatchNorm into per-channel scale/shift (f32 epilogue).
    # TODO(synk): training-mode BatchNorm (batch statistics) is not implemented.
    if batch_norm:
        gamma, beta, mean, var = bn_params
        s = gamma / jnp.sqrt(var + eps)
        scale = s
        shift = (bias - mean) * s + beta
    else:
        scale = jnp.ones((Cout,), jnp.float32)
        shift = bias
    scale = jnp.pad(scale.astype(jnp.float32), (0, Cp - Cout),
                    constant_values=1.0).reshape(1, Cp)
    shift = jnp.pad(shift.astype(jnp.float32), (0, Cp - Cout)).reshape(1, Cp)

    kernel = functools.partial(
        _conv_block_kernel, THp=THp, PP=PP, Wpool=Wpool, Kdim=Kdim, Cp=Cp,
        relu=bool(activation))

    out_nhwc = pl.pallas_call(
        kernel,
        out_shape=jax.ShapeDtypeStruct((N, Hpool, Wpool, Cp), jnp.float32),
        grid=(N, RT),
        in_specs=[
            pl.BlockSpec((1, M, Kdim), lambda n, r: (n * RT + r, 0, 0)),
            pl.BlockSpec((Kdim, Cp), lambda n, r: (0, 0)),
            pl.BlockSpec((1, Cp), lambda n, r: (0, 0)),
            pl.BlockSpec((1, Cp), lambda n, r: (0, 0)),
        ],
        out_specs=pl.BlockSpec((1, THp, Wpool, Cp), lambda n, r: (n, r, 0, 0)),
        compiler_params=pltpu.CompilerParams(
            dimension_semantics=("parallel", "parallel")),
    )(patches, w2, scale, shift)

    # Drop channel padding, back to NCHW (PyTorch convention).
    out = out_nhwc[..., :Cout]
    return jnp.transpose(out, (0, 3, 1, 2))


if __name__ == "__main__":
    # ConvBlock(in_channels=4, out_channels=8, kernel_size=3, stride=1,
    #           padding=None (-> 1), batch_norm=False, max_pool=2, activation=True)
    key = jax.random.PRNGKey(0)
    kx, kw, kb = jax.random.split(key, 3)

    N, Cin, H, W = 2, 4, 16, 16
    Cout, K = 8, 3

    x = jax.random.normal(kx, (N, Cin, H, W), dtype=jnp.float32)
    fan_in = Cin * K * K
    bound = 1.0 / (fan_in ** 0.5)
    weight = jax.random.uniform(kw, (Cout, Cin, K, K), jnp.float32,
                                minval=-bound, maxval=bound)
    bias = jax.random.uniform(kb, (Cout,), jnp.float32,
                              minval=-bound, maxval=bound)

    fwd = jax.jit(lambda x_, w_, b_: conv_block(
        x_, w_, b_, stride=1, padding=None, batch_norm=False,
        max_pool=2, activation=True))
    out = jax.block_until_ready(fwd(x, weight, bias))

    # Reference with the same bf16-quantized operands and f32 accumulation
    # (matches the kernel's bf16 MXU path): conv -> bias -> maxpool -> relu.
    x_q = x.astype(jnp.bfloat16)
    w_q = weight.astype(jnp.bfloat16)
    ref = jax.lax.conv_general_dilated(
        x_q, w_q, window_strides=(1, 1), padding=[(1, 1), (1, 1)],
        dimension_numbers=("NCHW", "OIHW", "NCHW"),
        preferred_element_type=jnp.float32)
    ref = ref + bias.reshape(1, -1, 1, 1)
    ref = jax.lax.reduce_window(ref, -jnp.inf, jax.lax.max,
                                (1, 1, 2, 2), (1, 1, 2, 2), "VALID")
    ref = jnp.maximum(ref, 0.0)

    assert out.shape == (N, Cout, H // 2, W // 2), out.shape
    max_err = float(jnp.max(jnp.abs(out - ref)))
    assert jnp.allclose(out, ref, atol=2e-3, rtol=2e-3), max_err

    print("KERNEL_OK")
</pallas_src>

<mosaic_0001>
module attributes {stable_mosaic.version = 11 : i64} {
  func.func @_conv_block_kernel(%arg0: i32, %arg1: i32, %arg2: memref<1x128x36xbf16, #tpu.memory_space<vmem>>, %arg3: memref<36x128xbf16, #tpu.memory_space<vmem>>, %arg4: memref<1x128xf32, #tpu.memory_space<vmem>>, %arg5: memref<1x128xf32, #tpu.memory_space<vmem>>, %arg6: memref<1x4x8x128xf32, #tpu.memory_space<vmem>>) attributes {dimension_semantics = [#tpu.dimension_semantics<parallel>, #tpu.dimension_semantics<parallel>], iteration_bounds = array<i64: 2, 2>, scalar_prefetch = 0 : i64, scratch_operands = 0 : i64, tpu.core_type = #tpu.core_type<tc>, window_params = [{transform_indices = @transform_0, window_bounds = array<i64: 1, 128, 36>}, {pipeline_mode = #tpu.pipeline_mode<synchronous>, transform_indices = @transform_1, window_bounds = array<i64: 36, 128>}, {pipeline_mode = #tpu.pipeline_mode<synchronous>, transform_indices = @transform_2, window_bounds = array<i64: 1, 128>}, {pipeline_mode = #tpu.pipeline_mode<synchronous>, transform_indices = @transform_3, window_bounds = array<i64: 1, 128>}, {transform_indices = @transform_4, window_bounds = array<i64: 1, 4, 8, 128>}]} {
    %c0 = arith.constant 0 : index
    %c0_0 = arith.constant 0 : index
    %c0_1 = arith.constant 0 : index
    %0 = vector.load %arg2[%c0, %c0_0, %c0_1] : memref<1x128x36xbf16, #tpu.memory_space<vmem>>, vector<1x128x36xbf16>
    %1 = vector.shape_cast %0 : vector<1x128x36xbf16> to vector<128x36xbf16>
    %c0_2 = arith.constant 0 : index
    %c0_3 = arith.constant 0 : index
    %2 = vector.load %arg3[%c0_2, %c0_3] : memref<36x128xbf16, #tpu.memory_space<vmem>>, vector<36x128xbf16>
    %cst = arith.constant dense<0.000000e+00> : vector<128x128xf32>
    %3 = tpu.matmul %1, %2, %cst {dimension_numbers = #tpu.dot_dimension_numbers<[1], [0], [0], [1], [0, 0, 1, 1], [], []>} : vector<128x36xbf16>, vector<36x128xbf16>, vector<128x128xf32> -> vector<128x128xf32>
    %c0_4 = arith.constant 0 : index
    %c0_5 = arith.constant 0 : index
    %4 = vector.load %arg4[%c0_4, %c0_5] : memref<1x128xf32, #tpu.memory_space<vmem>>, vector<1x128xf32>
    %5 = vector.shape_cast %4 : vector<1x128xf32> to vector<128xf32>
    %6 = vector.shape_cast %5 : vector<128xf32> to vector<1x128xf32>
    %7 = vector.broadcast %6 : vector<1x128xf32> to vector<128x128xf32>
    %8 = arith.mulf %3, %7 : vector<128x128xf32>
    %c0_6 = arith.constant 0 : index
    %c0_7 = arith.constant 0 : index
    %9 = vector.load %arg5[%c0_6, %c0_7] : memref<1x128xf32, #tpu.memory_space<vmem>>, vector<1x128xf32>
    %10 = vector.shape_cast %9 : vector<1x128xf32> to vector<128xf32>
    %11 = vector.shape_cast %10 : vector<128xf32> to vector<1x128xf32>
    %12 = vector.broadcast %11 : vector<1x128xf32> to vector<128x128xf32>
    %13 = arith.addf %8, %12 : vector<128x128xf32>
    %14 = vector.shape_cast %13 : vector<128x128xf32> to vector<4x4x8x128xf32>
    %cst_8 = arith.constant dense<0xFF800000> : vector<4x8x128xf32>
    %15 = vector.multi_reduction <maximumf>, %14, %cst_8 [1] : vector<4x4x8x128xf32> to vector<4x8x128xf32>
    %cst_9 = arith.constant 0.000000e+00 : f32
    %16 = vector.broadcast %cst_9 : f32 to vector<4x8x128xf32>
    %17 = arith.maximumf %15, %16 : vector<4x8x128xf32>
    %c0_10 = arith.constant 0 : index
    %c0_11 = arith.constant 0 : index
    %c0_12 = arith.constant 0 : index
    %c0_13 = arith.constant 0 : index
    %18 = vector.load %arg6[%c0_10, %c0_11, %c0_12, %c0_13] : memref<1x4x8x128xf32, #tpu.memory_space<vmem>>, vector<1x4x8x128xf32>
    %19 = vector.shape_cast %18 : vector<1x4x8x128xf32> to vector<4x8x128xf32>
    %20 = vector.shape_cast %17 : vector<4x8x128xf32> to vector<1x4x8x128xf32>
    tpu.vector_store %arg6[%c0_10, %c0_11, %c0_12, %c0_13], %20 {strides = array<i32>} : memref<1x4x8x128xf32, #tpu.memory_space<vmem>>, vector<1x4x8x128xf32>,
    return
  }
  func.func @transform_0(%arg0: i32, %arg1: i32) -> (i32, i32, i32) {
    %c2_i32 = arith.constant 2 : i32
    %0 = arith.muli %arg0, %c2_i32 : i32
    %1 = arith.addi %0, %arg1 : i32
    %c0_i32 = arith.constant 0 : i32
    %c0_i32_0 = arith.constant 0 : i32
    %c0_i32_1 = arith.constant 0 : i32
    return %1, %c0_i32, %c0_i32_0 : i32, i32, i32
  }
  func.func @transform_1(%arg0: i32, %arg1: i32) -> (i32, i32) {
    %c0_i32 = arith.constant 0 : i32
    %c0_i32_0 = arith.constant 0 : i32
    %c0_i32_1 = arith.constant 0 : i32
    return %c0_i32, %c0_i32_0 : i32, i32
  }
  func.func @transform_2(%arg0: i32, %arg1: i32) -> (i32, i32) {
    %c0_i32 = arith.constant 0 : i32
    %c0_i32_0 = arith.constant 0 : i32
    %c0_i32_1 = arith.constant 0 : i32
    return %c0_i32, %c0_i32_0 : i32, i32
  }
  func.func @transform_3(%arg0: i32, %arg1: i32) -> (i32, i32) {
    %c0_i32 = arith.constant 0 : i32
    %c0_i32_0 = arith.constant 0 : i32
    %c0_i32_1 = arith.constant 0 : i32
    return %c0_i32, %c0_i32_0 : i32, i32
  }
  func.func @transform_4(%arg0: i32, %arg1: i32) -> (i32, i32, i32, i32) {
    %c0_i32 = arith.constant 0 : i32
    %c0_i32_0 = arith.constant 0 : i32
    %c0_i32_1 = arith.constant 0 : i32
    return %arg0, %arg1, %c0_i32, %c0_i32_0 : i32, i32, i32, i32
  }
}

</mosaic_0001>

<bundles_post_ra>
// kernel: _lambda_.1
= control target key start
LH: loop header
LB: loop body
LE: loop exit
PB: predicated region body
PF: predicated region fallthrough
CT: control target
= control target key end

     0   :  { %s782_s15 = smov 0   ;;  %s784_s16 = smov 0   ;;  %s865_s0 = inlined_call_operand.vmem [shape: bf16[4,128,36], index: 0, kind: input, shape index: {}]   ;;  %s866_s1 = inlined_call_operand.vmem [shape: bf16[36,128], index: 1, kind: input, shape index: {}]   ;;  %s867_s2 = inlined_call_operand.vmem [shape: f32[1,128], index: 2, kind: input, shape index: {}]   ;;  %s868_s3 = inlined_call_operand.vmem [shape: f32[1,128], index: 3, kind: input, shape index: {}]   ;;  %s869_s4 = inlined_call_operand.vmem [shape: f32[2,8,8,128], index: 4, kind: output, shape index: {}]  }
   0x1   :  { %s786_s17 = smov 0   ;;  %s788_s18 = smov 0  }
   0x2   :  { %s790_s19 = smov 0  }
   0x3 LB: > { %s23_s20 = sadd.s32 1, %s747_s17  ;;  %s26_s21 = sadd.s32 1, %s751_s18  ;;  %s755_s19 = sphi %s790_s19, %s14_s19   ;;  %s751_s18 = sphi %s788_s18, %s873_s18   ;;  %s747_s17 = sphi %s786_s17, %s872_s17   ;;  %s743_s16 = sphi %s784_s16, %s871_s16   ;;  %s739_s15 = sphi %s782_s15, %s870_s15  }
   0x4   : > { %p24_p0 = scmp.ge.s32.totalorder %s23_s20, 2  ;;  %p594_p1 = scmp.ge.s32.totalorder %s755_s19, 1 }
   0x5   : > { %p184_p2 = scmp.lt.s32.totalorder %s755_s19, 5 }
   0x6   : > { %s875_s20 = smov (%p24_p0, %s23_s20), 0  ;;  %s877_s21 = smov (!%p24_p0, %s26_s21), %s751_s18 }
   0x7   : > { %p185_p3 = pnand %p594_p1, %p184_p2  ;;  %p28_p4 = scmp.ge.s32.totalorder %s877_s21, 2 }
   0x8   : > { %v706_v0 = vld [vmem:[%s866_s1] sm:$0xff] (!%p185_p3)   ;;  %v707_v1 = vld [vmem:[%s866_s1 + $0x8] sm:$0xff] (!%p185_p3)   ;;  %s595_s26 = sshll.u32 (!%p185_p3), %s743_s16, 1  ;;  %v708_v2 = vld [vmem:[%s866_s1 + $0x10] ss:$0 sps:$4 sm:$0x33] (!%p185_p3)  }
   0x9   : > { %s879_s21 = smov (%p28_p4, %s877_s21), 0  ;;  %188 = sbr.rel (%p185_p3) target bundleno = 258 (0x102), region = 36 }
   0xa   : > { %636 = vmatprep.subr.bf16.mxu0 (!%p185_p3), %v706_v0  ;;  %658 = vmatprep.subr.bf16.mxu1 (!%p185_p3), %v706_v0  ;;  %s217_s27 = sadd.s32 (!%p185_p3), %s739_s15, %s595_s26  ;;  %vm337_vm0 = vcmask (!%p185_p3), 1041408   ;;  %vm312_vm1 = vcmask (!%p185_p3), 293888   ;;  %s598_s8 = sshll.u32 (!%p185_p3), %s739_s15, 2  ;;  %v620_v12 = vld [vmem:[%s867_s2] ss:$0 sm:$0xff] (!%p185_p3) }
   0xb   : > { %637 = vmatpush3.bf16.msra.mxu0 (!%p185_p3), %v706_v0  ;;  %661 = vmatpush3.bf16.msra.mxu1 (!%p185_p3), %v706_v0  ;;  %p218_p5 = scmp.lt.s32.totalorder (!%p185_p3), %s217_s27, 3  ;;  %v339_v3 = vsel (!%p185_p3), %vm337_vm0, %v708_v2, 0  ;;  %p226_p6 = scmp.lt.s32.totalorder (!%p185_p3), %s743_s16, 1  ;;  %v621_v21 = vld [vmem:[%s868_s3] ss:$0 sm:$0xff] (!%p185_p3) }
   0xc   : > { %638 = vmatprep.subr.bf16.mxu0 (!%p185_p3), %v707_v1  ;;  %659 = vmatprep.subr.bf16.mxu1 (!%p185_p3), %v707_v1  ;;  %p228_p7 = scmp.lt.s32.totalorder (!%p185_p3), %s598_s8, 7 }
   0xf   : > { %639 = vmatpush3.bf16.msra.mxu0 (!%p185_p3), %v707_v1  ;;  %662 = vmatpush3.bf16.msra.mxu1 (!%p185_p3), %v707_v1 }
  0x10   : > { %s881_s27 = smov (!%p218_p5, %s217_s27), 3  ;;  %664 = vmatprep.subr.msk.bf16.mxu0 %vm337_vm0, %v708_v2  ;;  %665 = vmatprep.subr.msk.bf16.mxu1 %vm337_vm0, %v708_v2  ;;  %s883_s16 = smov (!%p226_p6, %s743_s16), 1 }
  0x11   : > { %s624_s30 = sshll.u32 %s881_s27, 6  ;;  %s885_s8 = smov (!%p228_p7, %s598_s8), 7 }
  0x12   : > { %s222_s7 = scalar_lea.vmem %s865_s0, %s624_s30  ;;  %s599_s13 = sshll.u32 %s883_s16, 3 }
  0x13   : > { %v709_v4 = vld [vmem:[%s222_s7] sm:$0xff]   ;;  %641 = vmatpush3.bf16.msra.mxu0 %v339_v3  ;;  %663 = vmatpush3.bf16.msra.mxu1 %v339_v3  ;;  %v711_v6 = vld [vmem:[%s222_s7 + $0x8] sm:$0xff]   ;;  %v713_v8 = vld [vmem:[%s222_s7 + $0x10] sm:$0xff]   ;;  %s231_s14 = sadd.s32 %s599_s13, %s885_s8 }
  0x14   : > { %v710_v5 = vld [vmem:[%s222_s7 + $0x20] sm:$0xff]   ;;  %642 = vmatprep.mubr.msk.bf16.mxu0 %vm312_vm1, %v709_v4  ;;  %v712_v7 = vld [vmem:[%s222_s7 + $0x28] sm:$0xff]   ;;  %v714_v9 = vld [vmem:[%s222_s7 + $0x30] sm:$0xff]   ;;  %s600_s15 = sshll.u32 %s231_s14, 3 }
  0x15   : > { %650 = vmatprep.mubr.msk.bf16.mxu1 %vm312_vm1, %v710_v5  ;;  %v715_v10 = vld [vmem:[%s222_s7 + $0x18] sm:$0xff]   ;;  %s233_s23 = scalar_lea.vmem %s869_s4, %s600_s15 }
  0x16   : > { %643 = vmatmul.mubr.msk.bf16.vlgmr.msra.gmra.mrb[0].mxu0 %vm312_vm1, %v711_v6  ;;  %651 = vmatmul.mubr.msk.bf16.vlgmr.msra.gmra.mrb[0].mxu1 %vm312_vm1, %v712_v7  ;;  %v716_v11 = vld [vmem:[%s222_s7 + $0x38] sm:$0xff]  }
  0x17   : > { %646 = vmatprep.mubr.msk.bf16.mxu0 %vm312_vm1, %v713_v8  ;;  %654 = vmatprep.mubr.msk.bf16.mxu1 %vm312_vm1, %v714_v9 }
  0x1e   : > { %647 = vmatmul.mubr.msk.bf16.gmra.mrb[4].mxu0 %vm312_vm1, %v715_v10  ;;  %655 = vmatmul.mubr.msk.bf16.gmra.mrb[4].mxu1 %vm312_vm1, %v716_v11 }
  0xe9   : > { %v644_v13 = vpop.f32.mrb[0].mxu0  ;;  %v652_v14 = vpop.f32.mrb[0].mxu1 }
  0xea   : > { %v375_v15 = vpop.f32.mrb[1].mxu0  ;;  %v407_v16 = vpop.f32.mrb[1].mxu1  ;;  %v447_v24 = vmul.f32 %v644_v13, %v620_v12  ;;  %v455_v25 = vmul.f32 %v652_v14, %v620_v12 }
  0xeb   : > { %v445_v17 = vmul.f32 %v620_v12, %v375_v15  ;;  %v453_v18 = vmul.f32 %v620_v12, %v407_v16  ;;  %v645_v19 = vpop.f32.mrb[2].mxu0  ;;  %v653_v20 = vpop.f32.mrb[2].mxu1 }
  0xec   : > { %v378_v22 = vpop.f32.mrb[3].mxu0  ;;  %v410_v23 = vpop.f32.mrb[3].mxu1  ;;  %v448_v28 = vmul.f32 %v645_v19, %v620_v12  ;;  %v456_v29 = vmul.f32 %v653_v20, %v620_v12  ;;  %v470_v34 = vadd.f32 %v621_v21, %v447_v24  ;;  %v478_v35 = vadd.f32 %v621_v21, %v455_v25 }
  0xed   : > { %v446_v26 = vmul.f32 %v620_v12, %v378_v22  ;;  %v454_v27 = vmul.f32 %v620_v12, %v410_v23  ;;  %v468_v30 = vadd.f32 %v621_v21, %v445_v17  ;;  %v476_v31 = vadd.f32 %v621_v21, %v453_v18 }
  0xee   : > { %v471_v42 = vadd.f32 %v621_v21, %v448_v28  ;;  %v479_v43 = vadd.f32 %v621_v21, %v456_v29 }
  0xef   : > { %v469_v32 = vadd.f32 %v621_v21, %v446_v26  ;;  %v477_v33 = vadd.f32 %v621_v21, %v454_v27 }
  0xf1   : > { %v484_v36 = vmax.f32 %v468_v30, %v469_v32  ;;  %v490_v37 = vmax.f32 %v476_v31, %v477_v33  ;;  %v648_v38 = vpop.f32.mrb[4].mxu0  ;;  %v656_v39 = vpop.f32.mrb[4].mxu1 }
  0xf2   : > { %v391_v40 = vpop.f32.mrb[5].mxu0  ;;  %v423_v41 = vpop.f32.mrb[5].mxu1  ;;  %v451_v54 = vmul.f32 %v648_v38, %v620_v12  ;;  %v459_v55 = vmul.f32 %v656_v39, %v620_v12 }
  0xf3   : > { %v485_v44 = vmax.f32 %v484_v36, %v470_v34  ;;  %v491_v45 = vmax.f32 %v490_v37, %v478_v35  ;;  %v649_v46 = vpop.f32.mrb[6].mxu0  ;;  %v657_v47 = vpop.f32.mrb[6].mxu1  ;;  %v449_v48 = vmul.f32 %v620_v12, %v391_v40  ;;  %v457_v49 = vmul.f32 %v620_v12, %v423_v41 }
  0xf4   : > { %v394_v50 = vpop.f32.mrb[7].mxu0  ;;  %v426_v51 = vpop.f32.mrb[7].mxu1  ;;  %v452_v60 = vmul.f32 %v649_v46, %v620_v12  ;;  %v460_v61 = vmul.f32 %v657_v47, %v620_v12  ;;  %v474_v2 = vadd.f32 %v621_v21, %v451_v54  ;;  %v482_v3 = vadd.f32 %v621_v21, %v459_v55 }
  0xf5   : > { %v486_v52 = vmax.f32 %v485_v44, %v471_v42  ;;  %v492_v53 = vmax.f32 %v491_v45, %v479_v43  ;;  %v450_v56 = vmul.f32 %v620_v12, %v394_v50  ;;  %v458_v57 = vmul.f32 %v620_v12, %v426_v51 }
  0xf6   : > { %v472_v62 = vadd.f32 %v621_v21, %v449_v48  ;;  %v480_v63 = vadd.f32 %v621_v21, %v457_v49  ;;  %v475_v6 = vadd.f32 %v621_v21, %v452_v60  ;;  %v483_v7 = vadd.f32 %v621_v21, %v460_v61 }
  0xf7   : > { %v496_v58 = vmax.f32 %v486_v52, 0.0  ;;  %v498_v59 = vmax.f32 %v492_v53, 0.0  ;;  %v473_v0 = vadd.f32 %v621_v21, %v450_v56  ;;  %v481_v1 = vadd.f32 %v621_v21, %v458_v57 }
  0xf9   : > { %500 = vst [vmem:[%s233_s23] sm:$0xff] %v496_v58  ;;  %502 = vst [vmem:[%s233_s23 + $0x10] sm:$0xff] %v498_v59  ;;  %v487_v4 = vmax.f32 %v472_v62, %v473_v0  ;;  %v493_v5 = vmax.f32 %v480_v63, %v481_v1 }
  0xfb   : > { %v488_v8 = vmax.f32 %v487_v4, %v474_v2  ;;  %v494_v9 = vmax.f32 %v493_v5, %v482_v3 }
  0xfd   : > { %v489_v10 = vmax.f32 %v488_v8, %v475_v6  ;;  %v495_v11 = vmax.f32 %v494_v9, %v483_v7 }
  0xff   : > { %v497_v13 = vmax.f32 %v489_v10, 0.0  ;;  %v499_v14 = vmax.f32 %v495_v11, 0.0 }
 0x101   : > { %501 = vst [vmem:[%s233_s23 + $0x8] sm:$0xff] %v497_v13  ;;  %503 = vst [vmem:[%s233_s23 + $0x18] sm:$0xff] %v499_v14 }
 0x102 PF: > { %s14_s19 = sadd.s32 1, %s755_s19   ;;  %s870_s15 = smov %s747_s17 }
 0x103   : > { %p11_p8 = scmp.ge.s32.totalorder %s14_s19, 6   ;;  %s871_s16 = smov %s751_s18 }
 0x104   : > { %s872_s17 = smov %s875_s20  ;;  %s873_s18 = smov %s879_s21 }
 0x105   :  { %13 = sbr.rel (!%p11_p8) target bundleno = 3 (0x3), region = 66 }

</bundles_post_ra>
